<compile_context>
chip_gen: v7x
topology: tpu7x:2x2x1
jax: 0.10.0
libtpu: 0.0.40
codegen_flags: <defaults>
</compile_context>

<pallas_src>
import math

import jax
import jax.numpy as jnp
from jax.experimental import pallas as pl
from jax.experimental.pallas import tpu as pltpu


def uae_kernel(x_ref, w1_ref, b1_ref, w2g_ref, bg_ref, o_ref):
    # Streamed tile kept in its native dtype (f32 or bf16); MLP math in f32.
    x = x_ref[...]

    # uncertainty proxy hidden layer: Linear -> ReLU   (MXU + VPU)
    h = jnp.dot(x, w1_ref[...], preferred_element_type=jnp.float32) + b1_ref[...]
    h = jnp.maximum(h, 0.0)

    # Fused u -> gamma chain: gamma = sigmoid(h @ (w2 @ wg) + (b2*wg + bg))
    # (one small MXU matmul + EUP sigmoid instead of reduce + outer product).
    gamma = jax.nn.sigmoid(
        jnp.dot(h, w2g_ref[...], preferred_element_type=jnp.float32) + bg_ref[...])

    o_ref[...] = (x * gamma.astype(x.dtype)).astype(o_ref.dtype)


def _tpu_vmem_capacity_bytes():
    try:
        return int(pltpu.get_tpu_info().vmem_capacity_bytes)
    except Exception:
        return 64 * 1024 * 1024  # conservative default (v7x per-TC VMEM)


def _choose_tile_rows(n_rows, lane_width, itemsize, vmem_bytes):
    """Row tile: multiple of 8, sized for multi-MiB blocks inside a
    generation-aware VMEM budget; >= 4 grid steps for large streams so both
    v7x TensorCores get >= 2 blocks (no forced split for tiny problems)."""
    if n_rows <= 8:
        return n_rows
    budget = max(vmem_bytes // 4, 8 << 20)
    # per-row footprint: in + out double-buffered + f32 temporaries (gamma, prod)
    per_row = lane_width * (4 * itemsize + 3 * 4)
    tile = budget // per_row
    stream_bytes = 2 * n_rows * lane_width * itemsize  # total in + out
    if tile >= n_rows and stream_bytes < (8 << 20):
        return n_rows                      # single full block, splitting is pure overhead
    if stream_bytes >= (8 << 20):
        tile = min(tile, -(-n_rows // 4))  # aim for >= 4 grid steps (v7x megacore)
    tile = max(8, min(tile, n_rows))
    return (tile // 8) * 8


def uae_forward(embeddings, params, *, tile_n=None, fold_lanes=True):
    """embeddings: (..., D). Returns embeddings * gamma, same shape/dtype."""
    w1, b1, w2, b2, wg, bg = params
    orig_shape = embeddings.shape
    D = orig_shape[-1]
    x2d = embeddings.reshape(-1, D)
    N = x2d.shape[0]
    x_dt = x2d.dtype
    hidden = w1.shape[1]

    # Wrapper-side (tiny, one-time) weight folding: gamma = sigmoid(h @ W2g + bias_g).
    w1f = w1.astype(jnp.float32)
    b1f = b1.astype(jnp.float32)
    w2g = (w2 @ wg).astype(jnp.float32)            # (32, D)
    bias_g = (b2 @ wg + bg).astype(jnp.float32)    # (1, D)

    # Lane-dense folding: view (N, D) as (N/F, F*D) with F*D a multiple of 128 and
    # block-diagonal weights, so the streamed loads/stores are full 128-lane tiles.
    fold = 1
    if fold_lanes and D % 128 != 0:
        f = 128 // math.gcd(D, 128)
        if f <= 8 and f > 1 and N % f == 0 and N // f > 0:
            fold = f
    if fold > 1:
        x2d = x2d.reshape(N // fold, fold * D)                    # free row-major reshape
        w1f = jax.scipy.linalg.block_diag(*([w1f] * fold))        # (F*D, F*32)
        b1f = jnp.tile(b1f, (1, fold))                            # (1, F*32)
        w2g = jax.scipy.linalg.block_diag(*([w2g] * fold))        # (F*32, F*D)
        bias_g = jnp.tile(bias_g, (1, fold))                      # (1, F*D)

    n_rows, lane_width = x2d.shape
    hidden_width = hidden * fold

    # Keep bf16 streams bf16 through the first MXU matmul (no full-tile upcast).
    if x_dt == jnp.bfloat16:
        w1f = w1f.astype(jnp.bfloat16)

    vmem_bytes = _tpu_vmem_capacity_bytes()
    itemsize = x2d.dtype.itemsize
    if tile_n is None:
        tile_n = _choose_tile_rows(n_rows, lane_width, itemsize, vmem_bytes)
    else:
        tile_n = max(1, min(int(tile_n), n_rows))
        if tile_n < n_rows:  # respect the (8,128) block constraint
            tile_n = min(max(8, (tile_n // 8) * 8), n_rows)

    grid_steps = pl.cdiv(n_rows, tile_n)

    # vmem_limit from the actual footprint (generation-aware ceiling).
    block_bytes = tile_n * lane_width * itemsize
    weight_bytes = (w1f.size * w1f.dtype.itemsize + 4 * (w2g.size + b1f.size + bias_g.size))
    footprint = (4 * block_bytes                     # in + out, double-buffered
                 + 3 * tile_n * lane_width * 4       # f32 gamma / product temporaries
                 + 2 * tile_n * hidden_width * 4     # hidden activations
                 + 4 * weight_bytes)
    vmem_limit = max(32 << 20, int(footprint * 1.5))
    vmem_limit = int(min(vmem_limit, vmem_bytes * 3 // 4))

    out2d = pl.pallas_call(
        uae_kernel,
        out_shape=jax.ShapeDtypeStruct((n_rows, lane_width), x_dt),
        grid_spec=pltpu.PrefetchScalarGridSpec(
            num_scalar_prefetch=0,
            grid=(grid_steps,),
            in_specs=[
                pl.BlockSpec((tile_n, lane_width), lambda i: (i, 0)),   # x tile
                pl.BlockSpec(w1f.shape, lambda i: (0, 0)),              # W1 (folded)
                pl.BlockSpec(b1f.shape, lambda i: (0, 0)),              # b1 (folded)
                pl.BlockSpec(w2g.shape, lambda i: (0, 0)),              # W2g = w2 @ wg (folded)
                pl.BlockSpec(bias_g.shape, lambda i: (0, 0)),           # b2*wg + bg (folded)
            ],
            out_specs=pl.BlockSpec((tile_n, lane_width), lambda i: (i, 0)),
        ),
        compiler_params=pltpu.CompilerParams(
            dimension_semantics=("parallel",),
            vmem_limit_bytes=vmem_limit,
        ),
    )(x2d, w1f, b1f, w2g, bias_g)

    return out2d.reshape(orig_shape)


def uae_reference(embeddings, params):
    """Plain-JAX reference matching the PyTorch forward (mc_predictions=None)."""
    w1, b1, w2, b2, wg, bg = params
    h = jnp.maximum(embeddings @ w1 + b1[0], 0.0)
    u = h @ w2 + b2[0]                          # (..., 1)
    gamma = jax.nn.sigmoid(u * wg[0] + bg[0])   # (..., D)
    return embeddings * gamma


def init_params(key, embed_dim):
    """Deterministic synthetic parameters (shapes match the nn.Module __init__)."""
    k1, k2, k3, k4, k5, k6 = jax.random.split(key, 6)
    w1 = jax.random.normal(k1, (embed_dim, 32), jnp.float32) * 0.1   # uncertainty_proxy[0]
    b1 = jax.random.normal(k2, (1, 32), jnp.float32) * 0.1
    w2 = jax.random.normal(k3, (32, 1), jnp.float32) * 0.1           # uncertainty_proxy[2]
    b2 = jax.random.normal(k4, (1, 1), jnp.float32) * 0.1
    wg = jax.random.normal(k5, (1, embed_dim), jnp.float32) * 0.1    # gamma[0] (Linear(1, D))
    bg = jax.random.normal(k6, (1, embed_dim), jnp.float32) * 0.1
    return (w1, b1, w2, b2, wg, bg)


if __name__ == "__main__":
    embed_dim = 64
    key = jax.random.PRNGKey(0)
    k_x, k_x2, k_p = jax.random.split(key, 3)
    params = init_params(k_p, embed_dim)

    # Main check: (B, S, D) = (2, 8, 64) -> N=16, exercises the lane-dense folded path.
    B, S = 2, 8
    embeddings = jax.random.normal(k_x, (B, S, embed_dim), jnp.float32)
    out = jax.block_until_ready(uae_forward(embeddings, params))
    ref = uae_reference(embeddings, params)
    assert out.shape == embeddings.shape
    assert jnp.allclose(out, ref, atol=1e-5, rtol=1e-5), "mismatch vs reference"

    # Ragged-row check (N = 15, odd -> no fold, single full block, no padding).
    emb2 = jax.random.normal(k_x2, (3, 5, embed_dim), jnp.float32)
    out2 = jax.block_until_ready(uae_forward(emb2, params))
    ref2 = uae_reference(emb2, params)
    assert jnp.allclose(out2, ref2, atol=1e-5, rtol=1e-5), "mismatch vs reference (ragged)"

    # Edge-block check: N = 15 with tile_n=8 -> grid of 2 with a masked partial
    # edge block (exercises Pallas's non-divisible block handling, no jnp.pad).
    out3 = jax.block_until_ready(uae_forward(emb2, params, tile_n=8, fold_lanes=False))
    assert jnp.allclose(out3, ref2, atol=1e-5, rtol=1e-5), "mismatch vs reference (edge block)"

    print("KERNEL_OK")
</pallas_src>

<mosaic_0001>
module attributes {stable_mosaic.version = 11 : i64} {
  func.func @uae_kernel(%arg0: i32, %arg1: memref<8x128xf32, #tpu.memory_space<vmem>>, %arg2: memref<128x64xf32, #tpu.memory_space<vmem>>, %arg3: memref<1x64xf32, #tpu.memory_space<vmem>>, %arg4: memref<64x128xf32, #tpu.memory_space<vmem>>, %arg5: memref<1x128xf32, #tpu.memory_space<vmem>>, %arg6: memref<8x128xf32, #tpu.memory_space<vmem>>) attributes {dimension_semantics = [#tpu.dimension_semantics<parallel>], iteration_bounds = array<i64: 1>, scalar_prefetch = 0 : i64, scratch_operands = 0 : i64, tpu.core_type = #tpu.core_type<tc>, window_params = [{transform_indices = @transform_0, window_bounds = array<i64: 8, 128>}, {pipeline_mode = #tpu.pipeline_mode<synchronous>, transform_indices = @transform_1, window_bounds = array<i64: 128, 64>}, {pipeline_mode = #tpu.pipeline_mode<synchronous>, transform_indices = @transform_2, window_bounds = array<i64: 1, 64>}, {pipeline_mode = #tpu.pipeline_mode<synchronous>, transform_indices = @transform_3, window_bounds = array<i64: 64, 128>}, {pipeline_mode = #tpu.pipeline_mode<synchronous>, transform_indices = @transform_4, window_bounds = array<i64: 1, 128>}, {transform_indices = @transform_5, window_bounds = array<i64: 8, 128>}]} {
    %c0 = arith.constant 0 : index
    %c0_0 = arith.constant 0 : index
    %0 = vector.load %arg1[%c0, %c0_0] : memref<8x128xf32, #tpu.memory_space<vmem>>, vector<8x128xf32>
    %c0_1 = arith.constant 0 : index
    %c0_2 = arith.constant 0 : index
    %1 = vector.load %arg2[%c0_1, %c0_2] : memref<128x64xf32, #tpu.memory_space<vmem>>, vector<128x64xf32>
    %cst = arith.constant dense<0.000000e+00> : vector<8x64xf32>
    %2 = tpu.matmul %0, %1, %cst {dimension_numbers = #tpu.dot_dimension_numbers<[1], [0], [0], [1], [0, 0, 1, 1], [], []>} : vector<8x128xf32>, vector<128x64xf32>, vector<8x64xf32> -> vector<8x64xf32>
    %c0_3 = arith.constant 0 : index
    %c0_4 = arith.constant 0 : index
    %3 = vector.load %arg3[%c0_3, %c0_4] : memref<1x64xf32, #tpu.memory_space<vmem>>, vector<1x64xf32>
    %4 = vector.broadcast %3 : vector<1x64xf32> to vector<8x64xf32>
    %5 = arith.addf %2, %4 : vector<8x64xf32>
    %cst_5 = arith.constant 0.000000e+00 : f32
    %6 = vector.broadcast %cst_5 : f32 to vector<8x64xf32>
    %7 = arith.maximumf %5, %6 : vector<8x64xf32>
    %c0_6 = arith.constant 0 : index
    %c0_7 = arith.constant 0 : index
    %8 = vector.load %arg4[%c0_6, %c0_7] : memref<64x128xf32, #tpu.memory_space<vmem>>, vector<64x128xf32>
    %cst_8 = arith.constant dense<0.000000e+00> : vector<8x128xf32>
    %9 = tpu.matmul %7, %8, %cst_8 {dimension_numbers = #tpu.dot_dimension_numbers<[1], [0], [0], [1], [0, 0, 1, 1], [], []>} : vector<8x64xf32>, vector<64x128xf32>, vector<8x128xf32> -> vector<8x128xf32>
    %c0_9 = arith.constant 0 : index
    %c0_10 = arith.constant 0 : index
    %10 = vector.load %arg5[%c0_9, %c0_10] : memref<1x128xf32, #tpu.memory_space<vmem>>, vector<1x128xf32>
    %11 = vector.broadcast %10 : vector<1x128xf32> to vector<8x128xf32>
    %12 = arith.addf %9, %11 : vector<8x128xf32>
    %13 = arith.negf %12 : vector<8x128xf32>
    %14 = math.exp %13 : vector<8x128xf32>
    %cst_11 = arith.constant 1.000000e+00 : f32
    %15 = vector.broadcast %cst_11 : f32 to vector<8x128xf32>
    %16 = arith.addf %15, %14 : vector<8x128xf32>
    %17 = arith.divf %15, %16 : vector<8x128xf32>
    %18 = arith.mulf %0, %17 : vector<8x128xf32>
    %c0_12 = arith.constant 0 : index
    %c0_13 = arith.constant 0 : index
    %19 = vector.load %arg6[%c0_12, %c0_13] : memref<8x128xf32, #tpu.memory_space<vmem>>, vector<8x128xf32>
    tpu.vector_store %arg6[%c0_12, %c0_13], %18 {strides = array<i32>} : memref<8x128xf32, #tpu.memory_space<vmem>>, vector<8x128xf32>,
    return
  }
  func.func @transform_0(%arg0: i32) -> (i32, i32) {
    %c0_i32 = arith.constant 0 : i32
    %c0_i32_0 = arith.constant 0 : i32
    return %arg0, %c0_i32 : i32, i32
  }
  func.func @transform_1(%arg0: i32) -> (i32, i32) {
    %c0_i32 = arith.constant 0 : i32
    %c0_i32_0 = arith.constant 0 : i32
    %c0_i32_1 = arith.constant 0 : i32
    return %c0_i32, %c0_i32_0 : i32, i32
  }
  func.func @transform_2(%arg0: i32) -> (i32, i32) {
    %c0_i32 = arith.constant 0 : i32
    %c0_i32_0 = arith.constant 0 : i32
    %c0_i32_1 = arith.constant 0 : i32
    return %c0_i32, %c0_i32_0 : i32, i32
  }
  func.func @transform_3(%arg0: i32) -> (i32, i32) {
    %c0_i32 = arith.constant 0 : i32
    %c0_i32_0 = arith.constant 0 : i32
    %c0_i32_1 = arith.constant 0 : i32
    return %c0_i32, %c0_i32_0 : i32, i32
  }
  func.func @transform_4(%arg0: i32) -> (i32, i32) {
    %c0_i32 = arith.constant 0 : i32
    %c0_i32_0 = arith.constant 0 : i32
    %c0_i32_1 = arith.constant 0 : i32
    return %c0_i32, %c0_i32_0 : i32, i32
  }
  func.func @transform_5(%arg0: i32) -> (i32, i32) {
    %c0_i32 = arith.constant 0 : i32
    %c0_i32_0 = arith.constant 0 : i32
    return %arg0, %c0_i32 : i32, i32
  }
}

</mosaic_0001>

<bundles_post_ra>
// kernel: tpu_custom_call.1
= control target key start
LH: loop header
LB: loop body
LE: loop exit
PB: predicated region body
PF: predicated region fallthrough
CT: control target
= control target key end

     0   :  { %v379_v3 = vmov 0.0|0.0   ;;  %vm380_vm0 = vmmov 0   ;;  %v381_v6 = vmov 0.0   ;;  %s506_s0 = inlined_call_operand.vmem [shape: f32[8,128], index: 0, kind: input, shape index: {}]   ;;  %s507_s1 = inlined_call_operand.vmem [shape: f32[128,64], index: 1, kind: input, shape index: {}]   ;;  %s508_s2 = inlined_call_operand.vmem [shape: f32[1,64], index: 2, kind: input, shape index: {}]   ;;  %s509_s3 = inlined_call_operand.vmem [shape: f32[64,128], index: 3, kind: input, shape index: {}]   ;;  %s510_s4 = inlined_call_operand.vmem [shape: f32[1,128], index: 4, kind: input, shape index: {}]   ;;  %s511_s5 = inlined_call_operand.hbm [shape: f32[8,128], index: 5, kind: output, shape index: {}]  }
   0x1   :  { %v22_v0 = vld [vmem:[%s507_s1] sm:$0xff]  ;;  %v23_v1 = vld [vmem:[%s507_s1 + $0x8] sm:$0xff]  ;;  %v24_v2 = vld [vmem:[%s507_s1 + $0x10] sm:$0xff]  ;;  %311 = vmatprep.subr.bf16.mxu0 %v379_v3  ;;  %289 = vmatprep.mubr.msk.f32.mxu0 %vm380_vm0, %v381_v6 }
   0x2   :  { %v312_v4 = vpack.c.bf16 %v23_v1, %v22_v0  ;;  %v25_v5 = vld [vmem:[%s507_s1 + $0x18] sm:$0xff]  ;;  %335 = vmatprep.subr.bf16.mxu1 %v379_v3  ;;  %308 = vmatprep.mubr.msk.f32.mxu1 %vm380_vm0, %v381_v6  ;;  %v26_v8 = vld [vmem:[%s507_s1 + $0x20] sm:$0xff]  ;;  %v27_v9 = vld [vmem:[%s507_s1 + $0x28] sm:$0xff] }
   0x3   :  { %v315_v7 = vpack.c.bf16 %v25_v5, %v24_v2  ;;  %v116_v10 = vld [vmem:[%s509_s3] sm:$0xff]  ;;  %v117_v11 = vld [vmem:[%s509_s3 + $0x8] sm:$0xff]  ;;  %v118_v12 = vld [vmem:[%s509_s3 + $0x10] sm:$0xff]  ;;  %v318_v14 = vpack.c.bf16 %v27_v9, %v26_v8 }
   0x4   :  { %313 = vmatpush3.bf16.msra.mxu0 %v312_v4  ;;  %v119_v13 = vld [vmem:[%s509_s3 + $0x18] sm:$0xff]  ;;  %v336_v15 = vpack.c.bf16 %v117_v11, %v116_v10  ;;  %v28_v16 = vld [vmem:[%s507_s1 + $0x30] sm:$0xff] }
   0x5   :  { %314 = vmatprep.subr.bf16.mxu0 %v379_v3  ;;  %v29_v17 = vld [vmem:[%s507_s1 + $0x38] sm:$0xff] }
   0x8   :  { %316 = vmatpush3.bf16.msra.mxu0 %v315_v7 }
   0x9   :  { %317 = vmatprep.subr.bf16.mxu0 %v379_v3 }
   0xa   :  { %10 = vsyncpa [#allocation3], 0  ;;  %337 = vmatpush3.bf16.msra.mxu1 %v336_v15  ;;  %v339_v18 = vpack.c.bf16 %v119_v13, %v118_v12  ;;  %v120_v19 = vld [vmem:[%s509_s3 + $0x20] sm:$0xff]  ;;  %v121_v20 = vld [vmem:[%s509_s3 + $0x28] sm:$0xff]  ;;  %v321_v21 = vpack.c.bf16 %v29_v17, %v28_v16  ;;  %vm131_vm1 = vcmask 523264  }
   0xb   :  { %338 = vmatprep.subr.bf16.mxu1 %v379_v3  ;;  %v30_v22 = vld [vmem:[%s507_s1 + $0x40] sm:$0xff]  ;;  %v31_v23 = vld [vmem:[%s507_s1 + $0x48] sm:$0xff]  ;;  %v342_v24 = vpack.c.bf16 %v121_v20, %v120_v19  ;;  %v32_v26 = vld [vmem:[%s507_s1 + $0x50] sm:$0xff] }
   0xc   :  { %319 = vmatpush3.bf16.msra.mxu0 %v318_v14  ;;  %v324_v25 = vpack.c.bf16 %v31_v23, %v30_v22  ;;  %v33_v27 = vld [vmem:[%s507_s1 + $0x58] sm:$0xff]  ;;  %v34_v29 = vld [vmem:[%s507_s1 + $0x60] sm:$0xff]  ;;  %v35_v30 = vld [vmem:[%s507_s1 + $0x68] sm:$0xff] }
   0xd   :  { %320 = vmatprep.subr.bf16.mxu0 %v379_v3  ;;  %v327_v28 = vpack.c.bf16 %v33_v27, %v32_v26  ;;  %v330_v31 = vpack.c.bf16 %v35_v30, %v34_v29  ;;  %v36_v32 = vld [vmem:[%s507_s1 + $0x70] sm:$0xff]  ;;  %v37_v33 = vld [vmem:[%s507_s1 + $0x78] sm:$0xff]  ;;  %v21_v35 = vld [vmem:[%s506_s0] sm:$0xff] }
   0xe   :  { %340 = vmatpush3.bf16.msra.mxu1 %v339_v18  ;;  %v333_v34 = vpack.c.bf16 %v37_v33, %v36_v32  ;;  %v122_v36 = vld [vmem:[%s509_s3 + $0x30] sm:$0xff]  ;;  %v123_v37 = vld [vmem:[%s509_s3 + $0x38] sm:$0xff]  ;;  %v227_v39 = vld [vmem:[%s508_s2] ss:$0 sm:$0xff]  ;;  %s382_s3 = smov [#allocation2]  }
   0xf   :  { %341 = vmatprep.subr.bf16.mxu1 %v379_v3  ;;  %v345_v38 = vpack.c.bf16 %v123_v37, %v122_v36  ;;  %v228_v44 = vld [vmem:[%s510_s4] ss:$0 sm:$0xff]  ;;  %s219_s2 = sshll.u32 %s382_s3, 4  ;;  %s220_s2 = int_to_ptr.vmem [resolvable:$true] %s219_s2 }
  0x10   :  { %322 = vmatpush3.bf16.msra.mxu0 %v321_v21  ;;  %s355_s20 = scalar_lea.vmem %s220_s2, 128  ;;  %p360_p1 = scmp.lt.s32.totalorder %s220_s2, %s220_s2 }
  0x11   :  { %323 = vmatprep.subr.bf16.mxu0 %v379_v3  ;;  %p356_p0 = scmp.ne.s32.totalorder %s220_s2, %s355_s20  ;;  %p361_p2 = scmp.lt.s32.totalorder %s355_s20, %s355_s20 }
  0x12   :  { %343 = vmatpush3.bf16.msra.mxu1 %v342_v24 }
  0x13   :  { %344 = vmatprep.subr.bf16.mxu1 %v379_v3  ;;  %p362_p3 = por %p361_p2, %p360_p1 }
  0x14   :  { %325 = vmatpush3.bf16.msra.mxu0 %v324_v25 }
  0x15   :  { %326 = vmatprep.subr.bf16.mxu0 %v379_v3  ;;  %p363_p4 = pnand %p362_p3, %p356_p0 }
  0x16   :  { %346 = vmatpush3.bf16.msra.mxu1 %v345_v38 }
  0x18   :  { %328 = vmatpush3.bf16.msra.mxu0 %v327_v28 }
  0x19   :  { %329 = vmatprep.subr.bf16.mxu0 %v379_v3 }
  0x1c   :  { %331 = vmatpush3.bf16.msra.mxu0 %v330_v31 }
  0x1d   :  { %332 = vmatprep.subr.bf16.mxu0 %v379_v3 }
  0x20   :  { %334 = vmatpush3.bf16.msra.mxu0 %v333_v34 }
  0x23   :  { %290 = vmatmul.mubr.f32.vlgmr.msra.gmra.mrb[0].mxu0 %v21_v35 }
  0xf6   :  { %v111_v40 = vpop.f32.mrb[0].mxu0 }
  0xf7   :  { %v112_v41 = vadd.f32 %v227_v39, %v111_v40  ;;  %v291_v42 = vpop.f32.mrb[1].mxu0 }
  0xf9   :  { %v115_v43 = vmax.f32 %v112_v41, 0.0 }
  0xfb   :  { %309 = vmatmul.mubr.msk.f32.vlgmr.msra.gmra.mrb[0].mxu1 %vm131_vm1, %v115_v43 }
 0x1ce   :  { %v201_v45 = vpop.f32.mrb[0].mxu1 }
 0x1cf   :  { %v202_v46 = vadd.f32 %v228_v44, %v201_v45  ;;  %v310_v47 = vpop.f32.mrb[1].mxu1 }
 0x1d1   :  { %v230_v48 = vmul.f32 -1.442695, %v202_v46 }
 0x1d3   :  { %351 = vpow2.f32 %v230_v48 }
 0x1dd   :  { %v352_v49 = vpop.eup %351 }
 0x1de   :  { %v208_v50 = vadd.f32 1.0, %v352_v49 }
 0x1e0   :  { %353 = vrcp.f32 %v208_v50 }
 0x1ea   :  { %v354_v51 = vpop.eup %353 }
 0x1eb   :  { %v211_v52 = vmul.f32 %v354_v51, %v21_v35 }
 0x1ed   :  { %212 = vst [vmem:[#allocation2] sm:$0xff] %v211_v52 }
 0x1ee   :  { %366 = shalt.err (!%p363_p4)
}
 0x1ef   :  { %s367_s22 = scalar_lea.hbm %s511_s5, 128 }
 0x1f0   :  { %p368_p5 = scmp.ne.s32.totalorder %s511_s5, %s367_s22  ;;  %p371_p6 = scmp.lt.u32.totalorder %s367_s22, %s511_s5 }
 0x1f2   :  { %p373_p7 = pnand %p371_p6, %p368_p5 }
 0x1f4   :  { %376 = shalt.err (!%p373_p7)
}
 0x1f5   :  { %222 = dma.vmem_to_hbm [thread:$0]  %s220_s2, 128, %s511_s5, [#allocation3]  }
 0x1f6   :  { %377 = dma.done.wait [#allocation3], 128  }
 0x1f7   :  { %378 = vsyncadd [#allocation3], 4294967168 }
 0x1f8   :  { %226 = vsyncpa [#allocation3], 1 }

</bundles_post_ra>
